<compile_context>
chip_gen: v7x
topology: tpu7x:2x2x1
jax: 0.10.0
libtpu: 0.0.40
codegen_flags: <defaults>
</compile_context>

<pallas_src>
import functools

import jax
import jax.numpy as jnp
from jax.experimental import pallas as pl
from jax.experimental.pallas import tpu as pltpu


def lstm_fc_kernel(xp_ref, whh_ref, wfc_ref, bfc_ref, out_ref, h_scr, c_scr):
    """One grid step = one chunk of `t_chunk` LSTM timesteps (+ FC at the very end).

    xp_ref  : (t_chunk, B, 4H) pre-projected input (x @ W_ih^T + b_ih + b_hh),
              gate order [i, f, o, g]
    whh_ref : (H, 4H)  hidden->hidden weights (transposed, gate-permuted)
    wfc_ref : (H, O)   FC weights (transposed)
    bfc_ref : (1, O)   FC bias
    out_ref : (B, O)   output (same block across the whole grid; written at last step)
    h_scr   : (B, H)   f32 VMEM scratch, hidden state carried across grid steps
    c_scr   : (B, H)   f32 VMEM scratch, cell state carried across grid steps
    """
    t_chunk = xp_ref.shape[0]
    H = whh_ref.shape[0]

    @pl.when(pl.program_id(0) == 0)
    def _init():
        h_scr[...] = jnp.zeros_like(h_scr)
        c_scr[...] = jnp.zeros_like(c_scr)

    whh = whh_ref[...]  # hoisted load; resident for the whole chunk

    def step(t, carry):
        h, c = carry
        # Only the h-dependent matmul is on the serial critical path; the input
        # projection and bias were precomputed for all timesteps at once.
        gates = xp_ref[t] + jnp.dot(h, whh, preferred_element_type=jnp.float32)
        # Gate order [i, f, o, g]: sigmoid over one contiguous 3H slice, tanh over
        # the last H slice (2 EUP pushes / step instead of 4).
        sig = jax.nn.sigmoid(gates[:, : 3 * H])
        g_g = jnp.tanh(gates[:, 3 * H:])
        i_g = sig[:, :H]
        f_g = sig[:, H:2 * H]
        o_g = sig[:, 2 * H:3 * H]
        c_new = f_g * c + i_g * g_g
        h_new = o_g * jnp.tanh(c_new)
        return (h_new, c_new)

    # Fully unroll the short fixed-trip chunk loop for cross-step scheduling.
    h, c = jax.lax.fori_loop(0, t_chunk, step, (h_scr[...], c_scr[...]), unroll=True)
    h_scr[...] = h
    c_scr[...] = c

    @pl.when(pl.program_id(0) == pl.num_programs(0) - 1)
    def _final():
        # FC on the final hidden state.  O is tiny here (masked store is
        # negligible); keep O a multiple of 128 if the head grows.
        out_ref[...] = (
            jnp.dot(h, wfc_ref[...], preferred_element_type=jnp.float32)
            + bfc_ref[...]
        )


def _permute_gates(a, axis=0):
    """PyTorch LSTM gate order [i, f, g, o] -> kernel order [i, f, o, g]."""
    i, f, g, o = jnp.split(a, 4, axis=axis)
    return jnp.concatenate([i, f, o, g], axis=axis)


def _pick_chunk(T, target=64):
    """Largest divisor of T that is <= target (static, shape-derived)."""
    c = min(T, target)
    while T % c:
        c -= 1
    return c


@functools.partial(jax.jit, static_argnames=("output_size", "t_chunk"))
def lstm_model_forward(x, w_ih, w_hh, b_ih, b_hh, w_fc, b_fc, *, output_size,
                       t_chunk=None):
    """x: (B, T, I) float32. Returns (B, output_size) float32."""
    B, T, I = x.shape
    H = w_hh.shape[1]

    # --- weight prep (gate permutation + transposes), done once by XLA ---------
    w_ih_p = _permute_gates(w_ih.astype(jnp.float32), axis=0)          # (4H, I)
    w_hh_p = _permute_gates(w_hh.astype(jnp.float32), axis=0)          # (4H, H)
    b_p = _permute_gates((b_ih + b_hh).astype(jnp.float32), axis=0)    # (4H,)

    # Hoist the input projection out of the recurrent loop: one big matmul over
    # all T timesteps, emitted directly time-major (no extra transpose of x),
    # with the combined bias folded in.
    x_proj = jnp.einsum(
        "bti,gi->tbg", x.astype(jnp.float32), w_ih_p,
        preferred_element_type=jnp.float32,
    ) + b_p                                                            # (T, B, 4H)

    whh_t = jnp.transpose(w_hh_p)                                      # (H, 4H)
    wfc_t = jnp.transpose(w_fc).astype(jnp.float32)                    # (H, O)
    bfc = b_fc.reshape(1, -1).astype(jnp.float32)                      # (1, O)

    if t_chunk is None:
        t_chunk = _pick_chunk(T)
    assert T % t_chunk == 0
    grid = (T // t_chunk,)

    return pl.pallas_call(
        lstm_fc_kernel,
        out_shape=jax.ShapeDtypeStruct((B, output_size), jnp.float32),
        grid_spec=pltpu.PrefetchScalarGridSpec(
            num_scalar_prefetch=0,
            grid=grid,
            in_specs=[
                # Stream the projection in T-chunks (double-buffered by Pallas).
                pl.BlockSpec((t_chunk, B, 4 * H), lambda t: (t, 0, 0)),
                # Weights: constant block index -> fetched once, stay resident.
                pl.BlockSpec((H, 4 * H), lambda t: (0, 0)),
                pl.BlockSpec((H, output_size), lambda t: (0, 0)),
                pl.BlockSpec((1, output_size), lambda t: (0, 0)),
            ],
            out_specs=pl.BlockSpec((B, output_size), lambda t: (0, 0)),
            scratch_shapes=[
                pltpu.VMEM((B, H), jnp.float32),   # h carry
                pltpu.VMEM((B, H), jnp.float32),   # c carry
            ],
        ),
        compiler_params=pltpu.CompilerParams(
            # Time axis is a true recurrence -> sequential.
            dimension_semantics=("arbitrary",),
        ),
    )(x_proj, whh_t, wfc_t, bfc)


def _ref_forward(x, w_ih, w_hh, b_ih, b_hh, w_fc, b_fc):
    """Pure-JAX reference matching PyTorch nn.LSTM (batch_first) + nn.Linear."""
    B, T, I = x.shape
    H = w_hh.shape[1]
    h = jnp.zeros((B, H), jnp.float32)
    c = jnp.zeros((B, H), jnp.float32)
    for t in range(T):
        gates = x[:, t, :] @ w_ih.T + b_ih + h @ w_hh.T + b_hh
        i_g = jax.nn.sigmoid(gates[:, 0:H])
        f_g = jax.nn.sigmoid(gates[:, H:2 * H])
        g_g = jnp.tanh(gates[:, 2 * H:3 * H])
        o_g = jax.nn.sigmoid(gates[:, 3 * H:4 * H])
        c = f_g * c + i_g * g_g
        h = o_g * jnp.tanh(c)
    return h @ w_fc.T + b_fc


if __name__ == "__main__":
    # Small shapes consistent with the module's forward.
    B, T = 2, 8            # batch, sequence length
    input_size = 16
    hidden_size = 32
    output_size = 4

    key = jax.random.PRNGKey(0)
    k = jax.random.split(key, 7)
    # PyTorch-style uniform(-1/sqrt(H), 1/sqrt(H)) init, deterministic.
    s = 1.0 / jnp.sqrt(hidden_size)
    w_ih = jax.random.uniform(k[0], (4 * hidden_size, input_size), jnp.float32, -s, s)
    w_hh = jax.random.uniform(k[1], (4 * hidden_size, hidden_size), jnp.float32, -s, s)
    b_ih = jax.random.uniform(k[2], (4 * hidden_size,), jnp.float32, -s, s)
    b_hh = jax.random.uniform(k[3], (4 * hidden_size,), jnp.float32, -s, s)
    w_fc = jax.random.uniform(k[4], (output_size, hidden_size), jnp.float32, -s, s)
    b_fc = jax.random.uniform(k[5], (output_size,), jnp.float32, -s, s)

    x = jax.random.normal(k[6], (B, T, input_size), jnp.float32)

    # t_chunk=4 -> grid of 2 steps: exercises the streamed-T / scratch-carry path.
    out = lstm_model_forward(
        x, w_ih, w_hh, b_ih, b_hh, w_fc, b_fc,
        output_size=output_size, t_chunk=4,
    )
    out = jax.block_until_ready(out)

    ref = _ref_forward(x, w_ih, w_hh, b_ih, b_hh, w_fc, b_fc)
    assert out.shape == (B, output_size)
    assert jnp.allclose(out, ref, atol=1e-5, rtol=1e-5), "mismatch vs reference"

    # Also check the default (single-chunk) path.
    out2 = jax.block_until_ready(
        lstm_model_forward(x, w_ih, w_hh, b_ih, b_hh, w_fc, b_fc,
                           output_size=output_size)
    )
    assert jnp.allclose(out2, ref, atol=1e-5, rtol=1e-5), "mismatch (default chunk)"

    print("KERNEL_OK")
</pallas_src>

<mosaic_0001>
module attributes {stable_mosaic.version = 11 : i64} {
  func.func @lstm_fc_kernel(%arg0: i32, %arg1: memref<4x2x128xf32, #tpu.memory_space<vmem>>, %arg2: memref<32x128xf32, #tpu.memory_space<vmem>>, %arg3: memref<32x4xf32, #tpu.memory_space<vmem>>, %arg4: memref<1x4xf32, #tpu.memory_space<vmem>>, %arg5: memref<2x4xf32, #tpu.memory_space<vmem>>, %arg6: memref<2x32xf32, #tpu.memory_space<vmem>>, %arg7: memref<2x32xf32, #tpu.memory_space<vmem>>) attributes {dimension_semantics = [#tpu.dimension_semantics<arbitrary>], iteration_bounds = array<i64: 2>, scalar_prefetch = 0 : i64, scratch_operands = 2 : i64, tpu.core_type = #tpu.core_type<tc>, window_params = [{transform_indices = @transform_0, window_bounds = array<i64: 4, 2, 128>}, {pipeline_mode = #tpu.pipeline_mode<synchronous>, transform_indices = @transform_1, window_bounds = array<i64: 32, 128>}, {pipeline_mode = #tpu.pipeline_mode<synchronous>, transform_indices = @transform_2, window_bounds = array<i64: 32, 4>}, {pipeline_mode = #tpu.pipeline_mode<synchronous>, transform_indices = @transform_3, window_bounds = array<i64: 1, 4>}, {pipeline_mode = #tpu.pipeline_mode<synchronous>, transform_indices = @transform_4, window_bounds = array<i64: 2, 4>}]} {
    %c0_i32 = arith.constant 0 : i32
    %0 = arith.cmpi eq, %arg0, %c0_i32 : i32
    %1 = arith.extui %0 : i1 to i32
    %c0_i32_0 = arith.constant 0 : i32
    %2 = arith.cmpi ne, %1, %c0_i32_0 : i32
    scf.if %2 {
      %cst_28 = arith.constant 0.000000e+00 : f32
      %95 = vector.broadcast %cst_28 : f32 to vector<2x32xf32>
      %c0_29 = arith.constant 0 : index
      %c0_30 = arith.constant 0 : index
      %96 = vector.load %arg6[%c0_29, %c0_30] : memref<2x32xf32, #tpu.memory_space<vmem>>, vector<2x32xf32>
      tpu.vector_store %arg6[%c0_29, %c0_30], %95 {strides = array<i32>} : memref<2x32xf32, #tpu.memory_space<vmem>>, vector<2x32xf32>,
      %cst_31 = arith.constant 0.000000e+00 : f32
      %97 = vector.broadcast %cst_31 : f32 to vector<2x32xf32>
      %c0_32 = arith.constant 0 : index
      %c0_33 = arith.constant 0 : index
      %98 = vector.load %arg7[%c0_32, %c0_33] : memref<2x32xf32, #tpu.memory_space<vmem>>, vector<2x32xf32>
      tpu.vector_store %arg7[%c0_32, %c0_33], %97 {strides = array<i32>} : memref<2x32xf32, #tpu.memory_space<vmem>>, vector<2x32xf32>,
    } else {
    }
    %c0 = arith.constant 0 : index
    %c0_1 = arith.constant 0 : index
    %3 = vector.load %arg2[%c0, %c0_1] : memref<32x128xf32, #tpu.memory_space<vmem>>, vector<32x128xf32>
    %c0_2 = arith.constant 0 : index
    %c0_3 = arith.constant 0 : index
    %4 = vector.load %arg6[%c0_2, %c0_3] : memref<2x32xf32, #tpu.memory_space<vmem>>, vector<2x32xf32>
    %c0_4 = arith.constant 0 : index
    %c0_5 = arith.constant 0 : index
    %5 = vector.load %arg7[%c0_4, %c0_5] : memref<2x32xf32, #tpu.memory_space<vmem>>, vector<2x32xf32>
    %c0_i32_6 = arith.constant 0 : i32
    %6 = arith.index_cast %c0_i32_6 : i32 to index
    %c0_7 = arith.constant 0 : index
    %c0_8 = arith.constant 0 : index
    %7 = vector.load %arg1[%6, %c0_7, %c0_8] : memref<4x2x128xf32, #tpu.memory_space<vmem>>, vector<1x2x128xf32>
    %8 = vector.shape_cast %7 : vector<1x2x128xf32> to vector<2x128xf32>
    %cst = arith.constant dense<0.000000e+00> : vector<2x128xf32>
    %9 = tpu.matmul %4, %3, %cst {dimension_numbers = #tpu.dot_dimension_numbers<[1], [0], [0], [1], [0, 0, 1, 1], [], []>} : vector<2x32xf32>, vector<32x128xf32>, vector<2x128xf32> -> vector<2x128xf32>
    %10 = arith.addf %8, %9 : vector<2x128xf32>
    %11 = vector.extract_strided_slice %10 {offsets = [0, 0], sizes = [2, 96], strides = [1, 1]} : vector<2x128xf32> to vector<2x96xf32>
    %12 = arith.negf %11 : vector<2x96xf32>
    %13 = math.exp %12 : vector<2x96xf32>
    %cst_9 = arith.constant 1.000000e+00 : f32
    %14 = vector.broadcast %cst_9 : f32 to vector<2x96xf32>
    %15 = arith.addf %14, %13 : vector<2x96xf32>
    %16 = arith.divf %14, %15 : vector<2x96xf32>
    %17 = vector.extract_strided_slice %10 {offsets = [0, 96], sizes = [2, 32], strides = [1, 1]} : vector<2x128xf32> to vector<2x32xf32>
    %18 = math.tanh %17 : vector<2x32xf32>
    %19 = vector.extract_strided_slice %16 {offsets = [0, 0], sizes = [2, 32], strides = [1, 1]} : vector<2x96xf32> to vector<2x32xf32>
    %20 = vector.extract_strided_slice %16 {offsets = [0, 32], sizes = [2, 32], strides = [1, 1]} : vector<2x96xf32> to vector<2x32xf32>
    %21 = vector.extract_strided_slice %16 {offsets = [0, 64], sizes = [2, 32], strides = [1, 1]} : vector<2x96xf32> to vector<2x32xf32>
    %22 = arith.mulf %20, %5 : vector<2x32xf32>
    %23 = arith.mulf %19, %18 : vector<2x32xf32>
    %24 = arith.addf %22, %23 : vector<2x32xf32>
    %25 = math.tanh %24 : vector<2x32xf32>
    %26 = arith.mulf %21, %25 : vector<2x32xf32>
    %c1_i32 = arith.constant 1 : i32
    %27 = arith.index_cast %c1_i32 : i32 to index
    %c0_10 = arith.constant 0 : index
    %c0_11 = arith.constant 0 : index
    %28 = vector.load %arg1[%27, %c0_10, %c0_11] : memref<4x2x128xf32, #tpu.memory_space<vmem>>, vector<1x2x128xf32>
    %29 = vector.shape_cast %28 : vector<1x2x128xf32> to vector<2x128xf32>
    %cst_12 = arith.constant dense<0.000000e+00> : vector<2x128xf32>
    %30 = tpu.matmul %26, %3, %cst_12 {dimension_numbers = #tpu.dot_dimension_numbers<[1], [0], [0], [1], [0, 0, 1, 1], [], []>} : vector<2x32xf32>, vector<32x128xf32>, vector<2x128xf32> -> vector<2x128xf32>
    %31 = arith.addf %29, %30 : vector<2x128xf32>
    %32 = vector.extract_strided_slice %31 {offsets = [0, 0], sizes = [2, 96], strides = [1, 1]} : vector<2x128xf32> to vector<2x96xf32>
    %33 = arith.negf %32 : vector<2x96xf32>
    %34 = math.exp %33 : vector<2x96xf32>
    %cst_13 = arith.constant 1.000000e+00 : f32
    %35 = vector.broadcast %cst_13 : f32 to vector<2x96xf32>
    %36 = arith.addf %35, %34 : vector<2x96xf32>
    %37 = arith.divf %35, %36 : vector<2x96xf32>
    %38 = vector.extract_strided_slice %31 {offsets = [0, 96], sizes = [2, 32], strides = [1, 1]} : vector<2x128xf32> to vector<2x32xf32>
    %39 = math.tanh %38 : vector<2x32xf32>
    %40 = vector.extract_strided_slice %37 {offsets = [0, 0], sizes = [2, 32], strides = [1, 1]} : vector<2x96xf32> to vector<2x32xf32>
    %41 = vector.extract_strided_slice %37 {offsets = [0, 32], sizes = [2, 32], strides = [1, 1]} : vector<2x96xf32> to vector<2x32xf32>
    %42 = vector.extract_strided_slice %37 {offsets = [0, 64], sizes = [2, 32], strides = [1, 1]} : vector<2x96xf32> to vector<2x32xf32>
    %43 = arith.mulf %41, %24 : vector<2x32xf32>
    %44 = arith.mulf %40, %39 : vector<2x32xf32>
    %45 = arith.addf %43, %44 : vector<2x32xf32>
    %46 = math.tanh %45 : vector<2x32xf32>
    %47 = arith.mulf %42, %46 : vector<2x32xf32>
    %c2_i32 = arith.constant 2 : i32
    %48 = arith.index_cast %c2_i32 : i32 to index
    %c0_14 = arith.constant 0 : index
    %c0_15 = arith.constant 0 : index
    %49 = vector.load %arg1[%48, %c0_14, %c0_15] : memref<4x2x128xf32, #tpu.memory_space<vmem>>, vector<1x2x128xf32>
    %50 = vector.shape_cast %49 : vector<1x2x128xf32> to vector<2x128xf32>
    %cst_16 = arith.constant dense<0.000000e+00> : vector<2x128xf32>
    %51 = tpu.matmul %47, %3, %cst_16 {dimension_numbers = #tpu.dot_dimension_numbers<[1], [0], [0], [1], [0, 0, 1, 1], [], []>} : vector<2x32xf32>, vector<32x128xf32>, vector<2x128xf32> -> vector<2x128xf32>
    %52 = arith.addf %50, %51 : vector<2x128xf32>
    %53 = vector.extract_strided_slice %52 {offsets = [0, 0], sizes = [2, 96], strides = [1, 1]} : vector<2x128xf32> to vector<2x96xf32>
    %54 = arith.negf %53 : vector<2x96xf32>
    %55 = math.exp %54 : vector<2x96xf32>
    %cst_17 = arith.constant 1.000000e+00 : f32
    %56 = vector.broadcast %cst_17 : f32 to vector<2x96xf32>
    %57 = arith.addf %56, %55 : vector<2x96xf32>
    %58 = arith.divf %56, %57 : vector<2x96xf32>
    %59 = vector.extract_strided_slice %52 {offsets = [0, 96], sizes = [2, 32], strides = [1, 1]} : vector<2x128xf32> to vector<2x32xf32>
    %60 = math.tanh %59 : vector<2x32xf32>
    %61 = vector.extract_strided_slice %58 {offsets = [0, 0], sizes = [2, 32], strides = [1, 1]} : vector<2x96xf32> to vector<2x32xf32>
    %62 = vector.extract_strided_slice %58 {offsets = [0, 32], sizes = [2, 32], strides = [1, 1]} : vector<2x96xf32> to vector<2x32xf32>
    %63 = vector.extract_strided_slice %58 {offsets = [0, 64], sizes = [2, 32], strides = [1, 1]} : vector<2x96xf32> to vector<2x32xf32>
    %64 = arith.mulf %62, %45 : vector<2x32xf32>
    %65 = arith.mulf %61, %60 : vector<2x32xf32>
    %66 = arith.addf %64, %65 : vector<2x32xf32>
    %67 = math.tanh %66 : vector<2x32xf32>
    %68 = arith.mulf %63, %67 : vector<2x32xf32>
    %c3_i32 = arith.constant 3 : i32
    %69 = arith.index_cast %c3_i32 : i32 to index
    %c0_18 = arith.constant 0 : index
    %c0_19 = arith.constant 0 : index
    %70 = vector.load %arg1[%69, %c0_18, %c0_19] : memref<4x2x128xf32, #tpu.memory_space<vmem>>, vector<1x2x128xf32>
    %71 = vector.shape_cast %70 : vector<1x2x128xf32> to vector<2x128xf32>
    %cst_20 = arith.constant dense<0.000000e+00> : vector<2x128xf32>
    %72 = tpu.matmul %68, %3, %cst_20 {dimension_numbers = #tpu.dot_dimension_numbers<[1], [0], [0], [1], [0, 0, 1, 1], [], []>} : vector<2x32xf32>, vector<32x128xf32>, vector<2x128xf32> -> vector<2x128xf32>
    %73 = arith.addf %71, %72 : vector<2x128xf32>
    %74 = vector.extract_strided_slice %73 {offsets = [0, 0], sizes = [2, 96], strides = [1, 1]} : vector<2x128xf32> to vector<2x96xf32>
    %75 = arith.negf %74 : vector<2x96xf32>
    %76 = math.exp %75 : vector<2x96xf32>
    %cst_21 = arith.constant 1.000000e+00 : f32
    %77 = vector.broadcast %cst_21 : f32 to vector<2x96xf32>
    %78 = arith.addf %77, %76 : vector<2x96xf32>
    %79 = arith.divf %77, %78 : vector<2x96xf32>
    %80 = vector.extract_strided_slice %73 {offsets = [0, 96], sizes = [2, 32], strides = [1, 1]} : vector<2x128xf32> to vector<2x32xf32>
    %81 = math.tanh %80 : vector<2x32xf32>
    %82 = vector.extract_strided_slice %79 {offsets = [0, 0], sizes = [2, 32], strides = [1, 1]} : vector<2x96xf32> to vector<2x32xf32>
    %83 = vector.extract_strided_slice %79 {offsets = [0, 32], sizes = [2, 32], strides = [1, 1]} : vector<2x96xf32> to vector<2x32xf32>
    %84 = vector.extract_strided_slice %79 {offsets = [0, 64], sizes = [2, 32], strides = [1, 1]} : vector<2x96xf32> to vector<2x32xf32>
    %85 = arith.mulf %83, %66 : vector<2x32xf32>
    %86 = arith.mulf %82, %81 : vector<2x32xf32>
    %87 = arith.addf %85, %86 : vector<2x32xf32>
    %88 = math.tanh %87 : vector<2x32xf32>
    %89 = arith.mulf %84, %88 : vector<2x32xf32>
    %c4_i32 = arith.constant 4 : i32
    %c0_22 = arith.constant 0 : index
    %c0_23 = arith.constant 0 : index
    %90 = vector.load %arg6[%c0_22, %c0_23] : memref<2x32xf32, #tpu.memory_space<vmem>>, vector<2x32xf32>
    tpu.vector_store %arg6[%c0_22, %c0_23], %89 {strides = array<i32>} : memref<2x32xf32, #tpu.memory_space<vmem>>, vector<2x32xf32>,
    %c0_24 = arith.constant 0 : index
    %c0_25 = arith.constant 0 : index
    %91 = vector.load %arg7[%c0_24, %c0_25] : memref<2x32xf32, #tpu.memory_space<vmem>>, vector<2x32xf32>
    tpu.vector_store %arg7[%c0_24, %c0_25], %87 {strides = array<i32>} : memref<2x32xf32, #tpu.memory_space<vmem>>, vector<2x32xf32>,
    %c1_i32_26 = arith.constant 1 : i32
    %92 = arith.cmpi eq, %arg0, %c1_i32_26 : i32
    %93 = arith.extui %92 : i1 to i32
    %c0_i32_27 = arith.constant 0 : i32
    %94 = arith.cmpi ne, %93, %c0_i32_27 : i32
    scf.if %94 {
      %c0_28 = arith.constant 0 : index
      %c0_29 = arith.constant 0 : index
      %95 = vector.load %arg3[%c0_28, %c0_29] : memref<32x4xf32, #tpu.memory_space<vmem>>, vector<32x4xf32>
      %cst_30 = arith.constant dense<0.000000e+00> : vector<2x4xf32>
      %96 = tpu.matmul %89, %95, %cst_30 {dimension_numbers = #tpu.dot_dimension_numbers<[1], [0], [0], [1], [0, 0, 1, 1], [], []>} : vector<2x32xf32>, vector<32x4xf32>, vector<2x4xf32> -> vector<2x4xf32>
      %c0_31 = arith.constant 0 : index
      %c0_32 = arith.constant 0 : index
      %97 = vector.load %arg4[%c0_31, %c0_32] : memref<1x4xf32, #tpu.memory_space<vmem>>, vector<1x4xf32>
      %98 = vector.broadcast %97 : vector<1x4xf32> to vector<2x4xf32>
      %99 = arith.addf %96, %98 : vector<2x4xf32>
      %c0_33 = arith.constant 0 : index
      %c0_34 = arith.constant 0 : index
      %100 = vector.load %arg5[%c0_33, %c0_34] : memref<2x4xf32, #tpu.memory_space<vmem>>, vector<2x4xf32>
      tpu.vector_store %arg5[%c0_33, %c0_34], %99 {strides = array<i32>} : memref<2x4xf32, #tpu.memory_space<vmem>>, vector<2x4xf32>,
    } else {
    }
    return
  }
  func.func @transform_0(%arg0: i32) -> (i32, i32, i32) {
    %c0_i32 = arith.constant 0 : i32
    %c0_i32_0 = arith.constant 0 : i32
    %c0_i32_1 = arith.constant 0 : i32
    return %arg0, %c0_i32, %c0_i32_0 : i32, i32, i32
  }
  func.func @transform_1(%arg0: i32) -> (i32, i32) {
    %c0_i32 = arith.constant 0 : i32
    %c0_i32_0 = arith.constant 0 : i32
    %c0_i32_1 = arith.constant 0 : i32
    return %c0_i32, %c0_i32_0 : i32, i32
  }
  func.func @transform_2(%arg0: i32) -> (i32, i32) {
    %c0_i32 = arith.constant 0 : i32
    %c0_i32_0 = arith.constant 0 : i32
    %c0_i32_1 = arith.constant 0 : i32
    return %c0_i32, %c0_i32_0 : i32, i32
  }
  func.func @transform_3(%arg0: i32) -> (i32, i32) {
    %c0_i32 = arith.constant 0 : i32
    %c0_i32_0 = arith.constant 0 : i32
    %c0_i32_1 = arith.constant 0 : i32
    return %c0_i32, %c0_i32_0 : i32, i32
  }
  func.func @transform_4(%arg0: i32) -> (i32, i32) {
    %c0_i32 = arith.constant 0 : i32
    %c0_i32_0 = arith.constant 0 : i32
    %c0_i32_1 = arith.constant 0 : i32
    return %c0_i32, %c0_i32_0 : i32, i32
  }
}

</mosaic_0001>

<bundles_post_ra>
// kernel: lstm_model_forward.1
= control target key start
LH: loop header
LB: loop body
LE: loop exit
PB: predicated region body
PF: predicated region fallthrough
CT: control target
= control target key end

     0   :  { %9 = vsyncpa [#allocation5], 0  ;;  %s1021_s15 = smov 0   ;;  %s1122_s0 = inlined_call_operand.vmem [shape: f32[8,2,128], index: 0, kind: input, shape index: {}]   ;;  %s1123_s1 = inlined_call_operand.vmem [shape: f32[32,128], index: 1, kind: input, shape index: {}]   ;;  %s1124_s2 = inlined_call_operand.vmem [shape: f32[32,4], index: 2, kind: input, shape index: {}]   ;;  %s1125_s3 = inlined_call_operand.vmem [shape: f32[1,4], index: 3, kind: input, shape index: {}]   ;;  %s1126_s4 = inlined_call_operand.hbm [shape: f32[2,4], index: 4, kind: output, shape index: {}]  }
   0x1 LB: > { %s1027_s16 = sadd.s32 4294967295, %s983_s15   ;;  %p758_p0 = scmp.ge.s32.totalorder %s983_s15, 1  ;;  %s983_s15 = sphi %s1021_s15, %s15_s15  }
   0x2   : > { %p159_p1 = scmp.lt.s32.totalorder %s983_s15, 3 }
   0x4   : > { %p160_p2 = pnand %p758_p0, %p159_p1 }
   0x5   : > { %s759_s17 = sshll.u32 (!%p160_p2), %s1027_s16, 2  ;;  %p761_p4 = scmp.ne.s32.totalorder (!%p160_p2), %s1027_s16, 0 }
   0x6   : > { %163 = sbr.rel (%p160_p2) target bundleno = 3078 (0xc06), region = 36  ;;  %p181_p3 = scmp.lt.s32.totalorder (!%p160_p2), %s759_s17, 7 }
   0xd   : > { %s1128_s17 = smov (!%p181_p3, %s759_s17), 7  ;;  %189 = sbr.rel (%p761_p4) target bundleno = 20 (0x14), region = 40 }
   0xe   : > { %s760_s18 = sshll.u32 %s1128_s17, 1  ;;  %vm190_vm0 = vcmask (!%p761_p4), 254976   ;;  %v985_v0 = vmov (!%p761_p4), 0.0  }
   0xf   : > { %s1035_s21 = scalar_lea.vmem %s1122_s0, %s760_s18  ;;  %191 = vst.msk [vmem:[#allocation2] sm:$0x3] (!%p761_p4), %vm190_vm0, %v985_v0  ;;  %192 = vst.msk [vmem:[#allocation3] sm:$0x3] (!%p761_p4), %vm190_vm0, %v985_v0 }
  0x14 PF: > { %v193_v1 = vld [vmem:[%s1123_s1] sm:$0xff]  ;;  %v194_v2 = vld [vmem:[%s1123_s1 + $0x8] sm:$0xff]  ;;  %v195_v3 = vld [vmem:[%s1123_s1 + $0x10] sm:$0xff]  ;;  %v986_v4 = vmov 0.0|0.0   ;;  %vm987_vm1 = vmmov 0   ;;  %v988_v7 = vmov 0.0  }
  0x15   : > { %860 = vmatprep.subr.bf16.mxu0 %v986_v4  ;;  %v861_v5 = vpack.c.bf16 %v194_v2, %v193_v1  ;;  %v196_v6 = vld [vmem:[%s1123_s1 + $0x18] sm:$0xff]  ;;  %813 = vmatprep.mubr.msk.f32.mxu0 %vm987_vm1, %v988_v7  ;;  %vm200_vm2 = vcmask 261120   ;;  %v199_v10 = vld [vmem:[%s1035_s21] sm:$0x3]  ;;  %s989_s30 = smov 32   ;;  %s990_s5 = smov 64  }
  0x16   : > { %866 = vmatprep.subr.bf16.mxu1 %v986_v4  ;;  %824 = vmatprep.mubr.msk.f32.mxu1 %vm987_vm1, %v988_v7  ;;  %v864_v8 = vpack.c.bf16 %v196_v6, %v195_v3  ;;  %v197_v9 = vld [vmem:[#allocation2] sm:$0x3]  ;;  %v198_v15 = vld [vmem:[#allocation3] sm:$0x3]  ;;  %v767_v48 = vld [vmem:[%s1035_s21 + $0x4] sm:$0x3] }
  0x17   : > { %862 = vmatpush3.bf16.msra.mxu0 %v861_v5  ;;  %868 = vmatpush3.bf16.msra.mxu1 %v861_v5  ;;  %v764_v30 = vld [vmem:[%s1035_s21 + $0x2] sm:$0x3]  ;;  %v770_v2 = vld [vmem:[%s1035_s21 + $0x6] sm:$0x3]  ;;  %s991_s6 = smov 96   ;;  %vm613_vm3 = vcmask 254976  }
  0x18   : > { %863 = vmatprep.subr.bf16.mxu0 %v986_v4  ;;  %869 = vmatprep.subr.bf16.mxu1 %v986_v4  ;;  %p773_p5 = scmp.ne.s32.totalorder %s1027_s16, 1 }
  0x19   : > { %vm993_vm4 = vmmov (!%p773_p5), 0   ;;  %vm707_vm5 = vcmask (!%p773_p5), 25600  }
  0x1b   : > { %865 = vmatpush3.bf16.msra.mxu0 %v864_v8  ;;  %871 = vmatpush3.bf16.msra.mxu1 %v864_v8 }
  0x1c   : > { %872 = vmatprep.subr.bf16.mxu0 %v986_v4  ;;  %878 = vmatprep.subr.bf16.mxu1 %v986_v4 }
  0x1e   : > { %814 = vmatmul.mubr.msk.f32.vlgmr.msra.gmra.mrb[0].mxu0 %vm200_vm2, %v197_v9 }
  0x1f   : > { %874 = vmatpush3.bf16.msra.mxu0 %v861_v5  ;;  %835 = vmatprep.mubr.msk.f32.mxu0 %vm987_vm1, %v988_v7 }
  0x20   : > { %875 = vmatprep.subr.bf16.mxu0 %v986_v4 }
  0x23   : > { %877 = vmatpush3.bf16.msra.mxu0 %v864_v8 }
  0xf1   : > { %v270_v11 = vpop.f32.mrb[0].mxu0 }
  0xf2   : > { %v274_v12 = vadd.f32 %v270_v11, %v199_v10  ;;  %v815_v13 = vpop.f32.mrb[1].mxu0 }
  0xf4   : > { %915 = vtanh.f32 %v274_v12  ;;  %v763_v16 = vmul.f32 -1.442695, %v274_v12 }
  0xf6   : > { %917 = vpow2.f32 %v763_v16 }
  0xfe   : > { %v916_v14 = vpop.eup %915 }
  0xff   : > { %288 = vrot.lane.b32.xlu0 %v916_v14, %s989_s30 }
 0x100   : > { %v918_v17 = vpop.eup %917 }
 0x101   : > { %v278_v18 = vadd.f32 1.0, %v918_v17 }
 0x103   : > { %283 = vrot.lane.b32.xlu0 %v198_v15, %s989_s30  ;;  %919 = vrcp.f32 %v278_v18 }
 0x10d   : > { %v920_v19 = vpop.eup %919 }
 0x171   : > { %v289_v20 = vpop.permute.xlu0 %288 }
 0x172   : > { %v291_v21 = vmul.f32 %v920_v19, %v289_v20 }
 0x174   : > { %293 = vrot.lane.b32.xlu1 %v291_v21, %s989_s30  ;;  %v624_v21 = vld [vmem:[%s1124_s2] sm:$0xff] (!%p773_p5) }
 0x175   : > { %v284_v22 = vpop.permute.xlu0 %283 }
 0x176   : > { %v286_v23 = vmul.f32 %v920_v19, %v284_v22  ;;  %v625_v22 = vld [vmem:[%s1124_s2 + $0x8] sm:$0xff] (!%p773_p5) }
 0x1e6   : > { %v294_v24 = vpop.permute.xlu1 %293 }
 0x1e7   : > { %v296_v25 = vadd.f32 %v294_v24, %v286_v23  ;;  %v626_v23 = vld [vmem:[%s1124_s2 + $0x10] sm:$0xff] (!%p773_p5)  ;;  %v992_v24 = vmov (!%p773_p5), 0.0|0.0  }
 0x1e8   : > { %884 = vmatprep.subr.bf16.mxu0 (!%p773_p5), %v992_v24 }
 0x1e9   : > { %921 = vtanh.f32 %v296_v25 }
 0x1f3   : > { %v922_v26 = vpop.eup %921 }
 0x1f4   : > { %299 = vrot.lane.b32.xlu1 %v922_v26, %s989_s30  ;;  %v627_v26 = vld [vmem:[%s1124_s2 + $0x18] sm:$0xff] (!%p773_p5) }
 0x266   : > { %v300_v27 = vpop.permute.xlu1 %299 }
 0x267   : > { %v302_v28 = vmul.f32 %v920_v19, %v300_v27  ;;  %v994_v27 = vmov (!%p773_p5), 0.0  }
 0x269   : > { %306 = vrot.lane.b32.xlu0 %v302_v28, %s990_s5  ;;  %v888_v28 = vpack.c.bf16 (!%p773_p5), %v627_v26, %v626_v23 }
 0x2db   : > { %v307_v29 = vpop.permute.xlu0 %306 }
 0x2dc   : > { %825 = vmatmul.mubr.msk.f32.vlgmr.msra.gmra.mrb[0].mxu1 %vm200_vm2, %v307_v29  ;;  %v774_v29 = vld [vmem:[%s1125_s3] ss:$0 sm:$0xff] (!%p773_p5) }
 0x2dd   : > { %880 = vmatpush3.bf16.msra.mxu1 %v861_v5  ;;  %846 = vmatprep.mubr.msk.f32.mxu1 %vm987_vm1, %v988_v7 }
 0x2de   : > { %881 = vmatprep.subr.bf16.mxu1 %v986_v4 }
 0x2e1   : > { %883 = vmatpush3.bf16.msra.mxu1 %v864_v8 }
 0x3af   : > { %v376_v31 = vpop.f32.mrb[0].mxu1 }
 0x3b0   : > { %v380_v32 = vadd.f32 %v764_v30, %v376_v31  ;;  %v826_v33 = vpop.f32.mrb[1].mxu1 }
 0x3b2   : > { %923 = vtanh.f32 %v380_v32  ;;  %v766_v35 = vmul.f32 -1.442695, %v380_v32 }
 0x3b4   : > { %925 = vpow2.f32 %v766_v35 }
 0x3bc   : > { %v924_v34 = vpop.eup %923 }
 0x3bd   : > { %390 = vrot.lane.b32.xlu1 %v924_v34, %s989_s30 }
 0x3be   : > { %v926_v36 = vpop.eup %925 }
 0x3bf   : > { %v384_v37 = vadd.f32 1.0, %v926_v36 }
 0x3c1   : > { %927 = vrcp.f32 %v384_v37 }
 0x3cb   : > { %v928_v38 = vpop.eup %927 }
 0x3cc   : > { %v388_v41 = vmul.f32 %v928_v38, %v296_v25  ;;  %v885_v25 = vpack.c.bf16 (!%p773_p5), %v625_v22, %v624_v21 }
 0x42f   : > { %v391_v39 = vpop.permute.xlu1 %390 }
 0x430   : > { %v393_v40 = vmul.f32 %v928_v38, %v391_v39 }
 0x432   : > { %395 = vrot.lane.b32.xlu0 %v393_v40, %s989_s30 }
 0x4a4   : > { %v396_v42 = vpop.permute.xlu0 %395 }
 0x4a5   : > { %v398_v43 = vadd.f32 %v396_v42, %v388_v41 }
 0x4a7   : > { %929 = vtanh.f32 %v398_v43 }
 0x4b1   : > { %v930_v44 = vpop.eup %929 }
 0x4b2   : > { %401 = vrot.lane.b32.xlu1 %v930_v44, %s989_s30 }
 0x524   : > { %v402_v45 = vpop.permute.xlu1 %401 }
 0x525   : > { %v404_v46 = vmul.f32 %v928_v38, %v402_v45 }
 0x527   : > { %408 = vrot.lane.b32.xlu0 %v404_v46, %s990_s5 }
 0x599   : > { %v409_v47 = vpop.permute.xlu0 %408 }
 0x59a   : > { %836 = vmatmul.mubr.msk.f32.vlgmr.msra.gmra.mrb[2].mxu0 %vm200_vm2, %v409_v47 }
 0x59b   : > { %857 = vmatprep.mubr.msk.f32.mxu0 (!%p773_p5), %vm993_vm4, %v994_v27  ;;  %886 = vmatpush3.bf16.msra.mxu0 (!%p773_p5), %v885_v25 }
 0x59c   : > { %887 = vmatprep.subr.bf16.mxu0 (!%p773_p5), %v992_v24 }
 0x59f   : > { %889 = vmatpush3.bf16.msra.mxu0 (!%p773_p5), %v888_v28 }
 0x66d   : > { %v478_v49 = vpop.f32.mrb[2].mxu0 }
 0x66e   : > { %v482_v50 = vadd.f32 %v767_v48, %v478_v49  ;;  %v837_v51 = vpop.f32.mrb[3].mxu0 }
 0x670   : > { %931 = vtanh.f32 %v482_v50  ;;  %v769_v53 = vmul.f32 -1.442695, %v482_v50 }
 0x672   : > { %933 = vpow2.f32 %v769_v53 }
 0x67a   : > { %v932_v52 = vpop.eup %931 }
 0x67b   : > { %492 = vrot.lane.b32.xlu1 %v932_v52, %s989_s30 }
 0x67c   : > { %v934_v54 = vpop.eup %933 }
 0x67d   : > { %v486_v55 = vadd.f32 1.0, %v934_v54 }
 0x67f   : > { %935 = vrcp.f32 %v486_v55 }
 0x689   : > { %v936_v56 = vpop.eup %935 }
 0x68a   : > { %v490_v59 = vmul.f32 %v936_v56, %v398_v43 }
 0x6ed   : > { %v493_v57 = vpop.permute.xlu1 %492 }
 0x6ee   : > { %v495_v58 = vmul.f32 %v936_v56, %v493_v57 }
 0x6f0   : > { %497 = vrot.lane.b32.xlu0 %v495_v58, %s989_s30 }
 0x762   : > { %v498_v60 = vpop.permute.xlu0 %497 }
 0x763   : > { %v500_v61 = vadd.f32 %v498_v60, %v490_v59 }
 0x765   : > { %937 = vtanh.f32 %v500_v61 }
 0x76f   : > { %v938_v62 = vpop.eup %937 }
 0x770   : > { %503 = vrot.lane.b32.xlu1 %v938_v62, %s989_s30 }
 0x7e2   : > { %v504_v63 = vpop.permute.xlu1 %503 }
 0x7e3   : > { %v506_v0 = vmul.f32 %v936_v56, %v504_v63 }
 0x7e5   : > { %510 = vrot.lane.b32.xlu0 %v506_v0, %s990_s5 }
 0x857   : > { %v511_v1 = vpop.permute.xlu0 %510 }
 0x858   : > { %847 = vmatmul.mubr.msk.f32.vlgmr.msra.gmra.mrb[2].mxu1 %vm200_vm2, %v511_v1 }
 0x92b   : > { %v580_v3 = vpop.f32.mrb[2].mxu1 }
 0x92c   : > { %v584_v4 = vadd.f32 %v770_v2, %v580_v3  ;;  %v848_v5 = vpop.f32.mrb[3].mxu1 }
 0x92e   : > { %939 = vtanh.f32 %v584_v4  ;;  %v772_v7 = vmul.f32 -1.442695, %v584_v4 }
 0x930   : > { %941 = vpow2.f32 %v772_v7 }
 0x938   : > { %v940_v6 = vpop.eup %939 }
 0x939   : > { %594 = vrot.lane.b32.xlu1 %v940_v6, %s989_s30 }
 0x93a   : > { %v942_v8 = vpop.eup %941 }
 0x93b   : > { %v588_v9 = vadd.f32 1.0, %v942_v8 }
 0x93d   : > { %943 = vrcp.f32 %v588_v9 }
 0x947   : > { %v944_v10 = vpop.eup %943 }
 0x948   : > { %v592_v13 = vmul.f32 %v944_v10, %v500_v61 }
 0x9ab   : > { %v595_v11 = vpop.permute.xlu1 %594 }
 0x9ac   : > { %v597_v12 = vmul.f32 %v944_v10, %v595_v11 }
 0x9ae   : > { %599 = vrot.lane.b32.xlu0 %v597_v12, %s989_s30 }
 0xa20   : > { %v600_v14 = vpop.permute.xlu0 %599 }
 0xa21   : > { %v602_v15 = vadd.f32 %v600_v14, %v592_v13 }
 0xa23   : > { %945 = vtanh.f32 %v602_v15 }
 0xa2d   : > { %v946_v16 = vpop.eup %945 }
 0xa2e   : > { %605 = vrot.lane.b32.xlu1 %v946_v16, %s989_s30 }
 0xa32   : > { %616 = vrot.lane.b32.xlu1 %v602_v15, %s991_s6 }
 0xaa0   : > { %v606_v17 = vpop.permute.xlu1 %605 }
 0xaa1   : > { %v608_v18 = vmul.f32 %v944_v10, %v606_v17 }
 0xaa3   : > { %610 = vrot.lane.b32.xlu0 %v608_v18, %s990_s5 }
 0xaa4   : > { %v617_v19 = vpop.permute.xlu1 %616 }
 0xaa5   : > { %619 = vst.msk [vmem:[#allocation3] sm:$0x3] %vm613_vm3, %v617_v19 }
 0xb10   : > { %623 = sbr.rel (%p773_p5) target bundleno = 3053 (0xbed), region = 44 }
 0xb15   : > { %v611_v20 = vpop.permute.xlu0 %610 }
 0xb16   : > { %614 = vst.msk [vmem:[#allocation2] sm:$0x3] %vm613_vm3, %v611_v20  ;;  %858 = vmatmul.mubr.msk.f32.vlgmr.msra.gmra.mrb[0].mxu0 (!%p773_p5), %vm200_vm2, %v611_v20 }
 0xbe9   : > { %v703_v30 = vpop.f32.mrb[0].mxu0 }
 0xbea   : > { %v704_v31 = vadd.f32 %v774_v29, %v703_v30  ;;  %v859_v32 = vpop.f32.mrb[1].mxu0 }
 0xbec   : > { %708 = vst.msk [vmem:[#allocation4] sm:$0x3] %vm707_vm5, %v704_v31 }
 0xbed PF: > { %p894_p6 = scmp.eq.s32.totalorder %s1027_s16, 1  ;;  %s995_s19 = smov [#allocation4]  }
 0xbee   : > { %s716_s20 = sshll.u32 %s995_s19, 4  ;;  %s717_s20 = int_to_ptr.vmem [resolvable:$true] %s716_s20 }
 0xbef   : > { %s947_s21 = scalar_lea.vmem %s717_s20, 32  ;;  %p954_p10 = scmp.lt.s32.totalorder %s717_s20, %s717_s20 }
 0xbf0   : > { %p948_p7 = scmp.ne.s32.totalorder %s717_s20, %s947_s21  ;;  %p955_p11 = scmp.lt.s32.totalorder %s947_s21, %s947_s21 }
 0xbf2   : > { %p949_p8 = pnand %p948_p7, %p894_p6  ;;  %p956_p12 = por %p955_p11, %p954_p10 }
 0xbf4   : > { %p950_p9 = pneg %p949_p8 }
 0xbf6   : > { %p957_p13 = pnand %p956_p12, %p950_p9 }
 0xbf8   : > { %960 = shalt.err (!%p957_p13)
}
 0xbf9   : > { %s961_s24 = scalar_lea.hbm %s1126_s4, 32 }
 0xbfa   : > { %p962_p0 = scmp.ne.s32.totalorder %s1126_s4, %s961_s24  ;;  %p967_p3 = scmp.lt.u32.totalorder %s961_s24, %s1126_s4 }
 0xbfc   : > { %p963_p1 = pnand %p962_p0, %p894_p6 }
 0xbfe   : > { %p964_p2 = pneg %p963_p1 }
 0xc00   : > { %p969_p4 = pnand %p967_p3, %p964_p2 }
 0xc02   : > { %972 = shalt.err (!%p969_p4)
}
 0xc03   : > { %891 = dma.vmem_to_hbm [thread:$0]  (%p894_p6), %s717_s20, 32, %s1126_s4, [#allocation5]  }
 0xc04   : > { %978 = dma.done.wait (%p894_p6), [#allocation5], 32  }
 0xc05   : > { %980 = vsyncadd (%p894_p6), [#allocation5], 4294967264 }
 0xc06 PF: > { %s15_s15 = sadd.s32 1, %s983_s15  }
 0xc07   : > { %p12_p5 = scmp.ge.s32.totalorder %s15_s15, 4  }
 0xc09   :  { %14 = sbr.rel (!%p12_p5) target bundleno = 1 (0x1), region = 74 }
 0xc10   :  { %729 = vsyncpa [#allocation5], 1 }
 0xc11   :  { %731 = vsyncpa [#allocation5 + $0x1], 1 }

</bundles_post_ra>
